<compile_context>
chip_gen: v7x
topology: tpu7x:2x2x1
jax: 0.10.0
libtpu: 0.0.40
codegen_flags: <defaults>
</compile_context>

<pallas_src>
import functools
import math

import jax
import jax.numpy as jnp
from jax.experimental import pallas as pl
from jax.experimental.pallas import tpu as pltpu

# -------------------- tiny BERT config --------------------
VOCAB = 100
H = 32            # hidden size
NH = 2            # attention heads
DH = H // NH      # head dim
INTER = 64        # intermediate (FFN) size
LAYERS = 2
MAX_POS = 16
TYPE_VOCAB = 2
NUM_LABELS = 2
LN_EPS = 1e-12


def _gelu_tanh(x):
    c = math.sqrt(2.0 / math.pi)
    return 0.5 * x * (1.0 + jnp.tanh(c * (x + 0.044715 * x * x * x)))


# -------------------- fused encoder kernel --------------------
def bert_encoder(x_sum, mask_add, params):
    """Run embedding-LN + all encoder layers in a single pallas_call.

    x_sum:    [B*S, H]  summed (word + position + token-type) embeddings
    mask_add: [B, S]    additive attention mask (0 or -1e9)
    returns:  [B*S, H]  final hidden states
    """
    BS, Hd = x_sum.shape
    B, S = mask_add.shape
    scale = 1.0 / math.sqrt(DH)

    def kernel(x_ref, mask_ref, embg_ref, embb_ref,
               wqkv_ref, bqkv_ref, wo_ref, bo_ref,
               ln1g_ref, ln1b_ref, w1_ref, b1_ref,
               w2_ref, b2_ref, ln2g_ref, ln2b_ref,
               h_ref):
        def layernorm(x, g, b):
            mu = jnp.mean(x, axis=-1, keepdims=True)
            var = jnp.mean((x - mu) * (x - mu), axis=-1, keepdims=True)
            return (x - mu) * jax.lax.rsqrt(var + LN_EPS) * g + b

        # --- step 0: embedding add + LayerNorm seeds the carried hidden state ---
        @pl.when(pl.program_id(0) == 0)
        def _():
            h_ref[...] = layernorm(x_ref[...], embg_ref[...], embb_ref[...])

        h = h_ref[...]                                            # [B*S, H]

        # --- fused QKV projection: one MXU pass over [H, 3H] ---
        qkv = (jnp.dot(h, wqkv_ref[0], preferred_element_type=jnp.float32)
               + bqkv_ref[0])                                     # [B*S, 3H]

        mask = mask_ref[...][:, None, :]                          # [B, 1, S]

        # --- multi-head attention, all heads inside this grid step ---
        ctx_heads = []
        for hd in range(NH):                                      # static -> unrolled
            q = qkv[:, hd * DH:(hd + 1) * DH].reshape(B, S, DH)
            k = qkv[:, H + hd * DH:H + (hd + 1) * DH].reshape(B, S, DH)
            v = qkv[:, 2 * H + hd * DH:2 * H + (hd + 1) * DH].reshape(B, S, DH)
            s = jnp.einsum("bqd,bkd->bqk", q, k,
                           preferred_element_type=jnp.float32) * scale + mask
            s = s - jnp.max(s, axis=-1, keepdims=True)
            p = jnp.exp(s)
            p = p * pl.reciprocal(jnp.sum(p, axis=-1, keepdims=True), approx=True)
            ctx_heads.append(jnp.einsum("bqk,bkd->bqd", p, v,
                                        preferred_element_type=jnp.float32))
        ctx = jnp.concatenate(ctx_heads, axis=-1).reshape(BS, H)  # merge heads

        # --- attention output projection + residual LayerNorm ---
        attn_out = (jnp.dot(ctx, wo_ref[0], preferred_element_type=jnp.float32)
                    + bo_ref[0])
        h1 = layernorm(attn_out + h, ln1g_ref[0], ln1b_ref[0])

        # --- FFN (GELU) + residual LayerNorm ---
        ff = (jnp.dot(h1, w1_ref[0], preferred_element_type=jnp.float32)
              + b1_ref[0])
        ff = _gelu_tanh(ff)
        ff2 = (jnp.dot(ff, w2_ref[0], preferred_element_type=jnp.float32)
               + b2_ref[0])
        h_ref[...] = layernorm(ff2 + h1, ln2g_ref[0], ln2b_ref[0])

    def full2(shape):
        return pl.BlockSpec(shape, lambda l: (0, 0))

    def layer3(shape):
        return pl.BlockSpec((1,) + tuple(shape[1:]), lambda l: (l, 0, 0))

    return pl.pallas_call(
        kernel,
        out_shape=jax.ShapeDtypeStruct((BS, Hd), jnp.float32),
        grid=(LAYERS,),
        in_specs=[
            full2((BS, Hd)),                 # summed embeddings
            full2((B, S)),                   # additive mask
            full2((1, Hd)),                  # emb LN gamma
            full2((1, Hd)),                  # emb LN beta
            layer3(params["wqkv"].shape),    # [L, H, 3H]
            layer3(params["bqkv"].shape),    # [L, 1, 3H]
            layer3(params["wo"].shape),      # [L, H, H]
            layer3(params["bo"].shape),      # [L, 1, H]
            layer3(params["ln1_g"].shape),   # [L, 1, H]
            layer3(params["ln1_b"].shape),
            layer3(params["w1"].shape),      # [L, H, INTER]
            layer3(params["b1"].shape),      # [L, 1, INTER]
            layer3(params["w2"].shape),      # [L, INTER, H]
            layer3(params["b2"].shape),      # [L, 1, H]
            layer3(params["ln2_g"].shape),
            layer3(params["ln2_b"].shape),
        ],
        # Constant output index map => hidden state stays VMEM-resident across
        # the (sequential) layer axis; written back to HBM once at the end.
        out_specs=pl.BlockSpec((BS, Hd), lambda l: (0, 0)),
        compiler_params=pltpu.CompilerParams(
            dimension_semantics=("arbitrary",)),
    )(x_sum, mask_add, params["emb_ln_g"], params["emb_ln_b"],
      params["wqkv"], params["bqkv"], params["wo"], params["bo"],
      params["ln1_g"], params["ln1_b"], params["w1"], params["b1"],
      params["w2"], params["b2"], params["ln2_g"], params["ln2_b"])


# -------------------- parameter init --------------------
def init_params(key):
    def normal(k, shape):
        return 0.02 * jax.random.normal(k, shape, dtype=jnp.float32)

    keys = iter(jax.random.split(key, 16))
    return {
        "word_emb": normal(next(keys), (VOCAB, H)),
        "pos_emb": normal(next(keys), (MAX_POS, H)),
        "tok_emb": normal(next(keys), (TYPE_VOCAB, H)),
        "emb_ln_g": jnp.ones((1, H), jnp.float32),
        "emb_ln_b": jnp.zeros((1, H), jnp.float32),
        # per-layer weights stacked on a leading layer axis; Q/K/V fused on N.
        "wqkv": normal(next(keys), (LAYERS, H, 3 * H)),
        "bqkv": jnp.zeros((LAYERS, 1, 3 * H), jnp.float32),
        "wo": normal(next(keys), (LAYERS, H, H)),
        "bo": jnp.zeros((LAYERS, 1, H), jnp.float32),
        "ln1_g": jnp.ones((LAYERS, 1, H), jnp.float32),
        "ln1_b": jnp.zeros((LAYERS, 1, H), jnp.float32),
        "w1": normal(next(keys), (LAYERS, H, INTER)),
        "b1": jnp.zeros((LAYERS, 1, INTER), jnp.float32),
        "w2": normal(next(keys), (LAYERS, INTER, H)),
        "b2": jnp.zeros((LAYERS, 1, H), jnp.float32),
        "ln2_g": jnp.ones((LAYERS, 1, H), jnp.float32),
        "ln2_b": jnp.zeros((LAYERS, 1, H), jnp.float32),
        "pool_w": normal(next(keys), (H, H)),
        "pool_b": jnp.zeros((H,), jnp.float32),
        "cls_w": normal(next(keys), (H, NUM_LABELS)),
        "cls_b": jnp.zeros((NUM_LABELS,), jnp.float32),
    }


# -------------------- forward pass --------------------
@functools.partial(jax.jit, static_argnums=())
def bert_forward(params, input_ids, token_type_ids, attention_mask, labels):
    B, S = input_ids.shape

    # ---- embeddings (gathers are glue; add + LN happens inside the kernel) ----
    word = jnp.take(params["word_emb"], input_ids, axis=0)                 # [B,S,H]
    pos = jnp.broadcast_to(params["pos_emb"][:S][None, :, :], (B, S, H))   # [B,S,H]
    tok = jnp.take(params["tok_emb"], token_type_ids, axis=0)              # [B,S,H]
    x_sum = (word + pos + tok).reshape(B * S, H)

    # ---- additive attention mask (HF: (1-mask)*min), kept tiny as [B,S] ----
    mask_add = (1.0 - attention_mask.astype(jnp.float32)) * -1e9           # [B,S]

    # ---- whole encoder in one fused Pallas kernel ----
    h = bert_encoder(x_sum, mask_add, params)                              # [B*S,H]
    h = h.reshape(B, S, H)

    # ---- pooler (dense+tanh on [CLS]), classifier, CE loss: plain JAX ----
    pooled = jnp.tanh(h[:, 0, :] @ params["pool_w"] + params["pool_b"])    # [B,H]
    logits = pooled @ params["cls_w"] + params["cls_b"]                    # [B,2]
    log_probs = jax.nn.log_softmax(logits, axis=-1)
    loss = -jnp.mean(jnp.take_along_axis(log_probs, labels[:, None], axis=-1))

    return {"loss": loss, "logits": logits}


# -------------------- main --------------------
if __name__ == "__main__":
    key = jax.random.PRNGKey(0)
    pkey, ikey, tkey = jax.random.split(key, 3)

    params = init_params(pkey)

    B, S = 2, 8
    input_ids = jax.random.randint(ikey, (B, S), 0, VOCAB, dtype=jnp.int32)
    token_type_ids = jax.random.randint(tkey, (B, S), 0, TYPE_VOCAB, dtype=jnp.int32)
    attention_mask = jnp.ones((B, S), dtype=jnp.int32)
    labels = jnp.array([0, 1], dtype=jnp.int32)

    out = bert_forward(params, input_ids, token_type_ids, attention_mask, labels)
    jax.block_until_ready(out)

    assert out["logits"].shape == (B, NUM_LABELS)
    assert out["loss"].shape == ()
    assert bool(jnp.all(jnp.isfinite(out["logits"])))
    print("KERNEL_OK")
</pallas_src>

<mosaic_0001>
module attributes {stable_mosaic.version = 11 : i64} {
  func.func @kernel(%arg0: i32, %arg1: memref<16x32xf32, #tpu.memory_space<vmem>>, %arg2: memref<2x8xf32, #tpu.memory_space<vmem>>, %arg3: memref<1x32xf32, #tpu.memory_space<vmem>>, %arg4: memref<1x32xf32, #tpu.memory_space<vmem>>, %arg5: memref<1x32x96xf32, #tpu.memory_space<vmem>>, %arg6: memref<1x1x96xf32, #tpu.memory_space<vmem>>, %arg7: memref<1x32x32xf32, #tpu.memory_space<vmem>>, %arg8: memref<1x1x32xf32, #tpu.memory_space<vmem>>, %arg9: memref<1x1x32xf32, #tpu.memory_space<vmem>>, %arg10: memref<1x1x32xf32, #tpu.memory_space<vmem>>, %arg11: memref<1x32x64xf32, #tpu.memory_space<vmem>>, %arg12: memref<1x1x64xf32, #tpu.memory_space<vmem>>, %arg13: memref<1x64x32xf32, #tpu.memory_space<vmem>>, %arg14: memref<1x1x32xf32, #tpu.memory_space<vmem>>, %arg15: memref<1x1x32xf32, #tpu.memory_space<vmem>>, %arg16: memref<1x1x32xf32, #tpu.memory_space<vmem>>, %arg17: memref<16x32xf32, #tpu.memory_space<vmem>>) attributes {dimension_semantics = [#tpu.dimension_semantics<arbitrary>], iteration_bounds = array<i64: 2>, scalar_prefetch = 0 : i64, scratch_operands = 0 : i64, tpu.core_type = #tpu.core_type<tc>, window_params = [{pipeline_mode = #tpu.pipeline_mode<synchronous>, transform_indices = @transform_0, window_bounds = array<i64: 16, 32>}, {pipeline_mode = #tpu.pipeline_mode<synchronous>, transform_indices = @transform_1, window_bounds = array<i64: 2, 8>}, {pipeline_mode = #tpu.pipeline_mode<synchronous>, transform_indices = @transform_2, window_bounds = array<i64: 1, 32>}, {pipeline_mode = #tpu.pipeline_mode<synchronous>, transform_indices = @transform_3, window_bounds = array<i64: 1, 32>}, {transform_indices = @transform_4, window_bounds = array<i64: 1, 32, 96>}, {transform_indices = @transform_5, window_bounds = array<i64: 1, 1, 96>}, {transform_indices = @transform_6, window_bounds = array<i64: 1, 32, 32>}, {transform_indices = @transform_7, window_bounds = array<i64: 1, 1, 32>}, {transform_indices = @transform_8, window_bounds = array<i64: 1, 1, 32>}, {transform_indices = @transform_9, window_bounds = array<i64: 1, 1, 32>}, {transform_indices = @transform_10, window_bounds = array<i64: 1, 32, 64>}, {transform_indices = @transform_11, window_bounds = array<i64: 1, 1, 64>}, {transform_indices = @transform_12, window_bounds = array<i64: 1, 64, 32>}, {transform_indices = @transform_13, window_bounds = array<i64: 1, 1, 32>}, {transform_indices = @transform_14, window_bounds = array<i64: 1, 1, 32>}, {transform_indices = @transform_15, window_bounds = array<i64: 1, 1, 32>}, {pipeline_mode = #tpu.pipeline_mode<synchronous>, transform_indices = @transform_16, window_bounds = array<i64: 16, 32>}]} {
    %c0_i32 = arith.constant 0 : i32
    %0 = arith.cmpi eq, %arg0, %c0_i32 : i32
    %1 = arith.extui %0 : i1 to i32
    %c0_i32_0 = arith.constant 0 : i32
    %2 = arith.cmpi ne, %1, %c0_i32_0 : i32
    scf.if %2 {
      %c0_69 = arith.constant 0 : index
      %c0_70 = arith.constant 0 : index
      %152 = vector.load %arg1[%c0_69, %c0_70] : memref<16x32xf32, #tpu.memory_space<vmem>>, vector<16x32xf32>
      %c0_71 = arith.constant 0 : index
      %c0_72 = arith.constant 0 : index
      %153 = vector.load %arg3[%c0_71, %c0_72] : memref<1x32xf32, #tpu.memory_space<vmem>>, vector<1x32xf32>
      %c0_73 = arith.constant 0 : index
      %c0_74 = arith.constant 0 : index
      %154 = vector.load %arg4[%c0_73, %c0_74] : memref<1x32xf32, #tpu.memory_space<vmem>>, vector<1x32xf32>
      %cst_75 = arith.constant dense<0.000000e+00> : vector<16xf32>
      %155 = vector.multi_reduction <add>, %152, %cst_75 [1] : vector<16x32xf32> to vector<16xf32>
      %156 = vector.shape_cast %155 : vector<16xf32> to vector<16x1xf32>
      %cst_76 = arith.constant 3.200000e+01 : f32
      %157 = vector.broadcast %cst_76 : f32 to vector<16x1xf32>
      %158 = arith.divf %156, %157 : vector<16x1xf32>
      %159 = vector.broadcast %158 : vector<16x1xf32> to vector<16x32xf32>
      %160 = arith.subf %152, %159 : vector<16x32xf32>
      %161 = vector.broadcast %158 : vector<16x1xf32> to vector<16x32xf32>
      %162 = arith.subf %152, %161 : vector<16x32xf32>
      %163 = arith.mulf %160, %162 : vector<16x32xf32>
      %cst_77 = arith.constant dense<0.000000e+00> : vector<16xf32>
      %164 = vector.multi_reduction <add>, %163, %cst_77 [1] : vector<16x32xf32> to vector<16xf32>
      %165 = vector.shape_cast %164 : vector<16xf32> to vector<16x1xf32>
      %cst_78 = arith.constant 3.200000e+01 : f32
      %166 = vector.broadcast %cst_78 : f32 to vector<16x1xf32>
      %167 = arith.divf %165, %166 : vector<16x1xf32>
      %168 = vector.broadcast %158 : vector<16x1xf32> to vector<16x32xf32>
      %169 = arith.subf %152, %168 : vector<16x32xf32>
      %cst_79 = arith.constant 9.99999996E-13 : f32
      %170 = vector.broadcast %cst_79 : f32 to vector<16x1xf32>
      %171 = arith.addf %167, %170 : vector<16x1xf32>
      %172 = math.rsqrt %171 : vector<16x1xf32>
      %173 = vector.broadcast %172 : vector<16x1xf32> to vector<16x32xf32>
      %174 = arith.mulf %169, %173 : vector<16x32xf32>
      %175 = vector.broadcast %153 : vector<1x32xf32> to vector<16x32xf32>
      %176 = arith.mulf %174, %175 : vector<16x32xf32>
      %177 = vector.broadcast %154 : vector<1x32xf32> to vector<16x32xf32>
      %178 = arith.addf %176, %177 : vector<16x32xf32>
      %c0_80 = arith.constant 0 : index
      %c0_81 = arith.constant 0 : index
      %179 = vector.load %arg17[%c0_80, %c0_81] : memref<16x32xf32, #tpu.memory_space<vmem>>, vector<16x32xf32>
      tpu.vector_store %arg17[%c0_80, %c0_81], %178 {strides = array<i32>} : memref<16x32xf32, #tpu.memory_space<vmem>>, vector<16x32xf32>,
    } else {
    }
    %c0 = arith.constant 0 : index
    %c0_1 = arith.constant 0 : index
    %3 = vector.load %arg17[%c0, %c0_1] : memref<16x32xf32, #tpu.memory_space<vmem>>, vector<16x32xf32>
    %c0_2 = arith.constant 0 : index
    %c0_3 = arith.constant 0 : index
    %c0_4 = arith.constant 0 : index
    %4 = vector.load %arg5[%c0_2, %c0_3, %c0_4] : memref<1x32x96xf32, #tpu.memory_space<vmem>>, vector<1x32x96xf32>
    %5 = vector.shape_cast %4 : vector<1x32x96xf32> to vector<32x96xf32>
    %cst = arith.constant dense<0.000000e+00> : vector<16x96xf32>
    %6 = tpu.matmul %3, %5, %cst {dimension_numbers = #tpu.dot_dimension_numbers<[1], [0], [0], [1], [0, 0, 1, 1], [], []>} : vector<16x32xf32>, vector<32x96xf32>, vector<16x96xf32> -> vector<16x96xf32>
    %c0_5 = arith.constant 0 : index
    %c0_6 = arith.constant 0 : index
    %c0_7 = arith.constant 0 : index
    %7 = vector.load %arg6[%c0_5, %c0_6, %c0_7] : memref<1x1x96xf32, #tpu.memory_space<vmem>>, vector<1x1x96xf32>
    %8 = vector.shape_cast %7 : vector<1x1x96xf32> to vector<1x96xf32>
    %9 = vector.broadcast %8 : vector<1x96xf32> to vector<16x96xf32>
    %10 = arith.addf %6, %9 : vector<16x96xf32>
    %c0_8 = arith.constant 0 : index
    %c0_9 = arith.constant 0 : index
    %11 = vector.load %arg2[%c0_8, %c0_9] : memref<2x8xf32, #tpu.memory_space<vmem>>, vector<2x8xf32>
    %12 = vector.shape_cast %11 : vector<2x8xf32> to vector<2x1x8xf32>
    %13 = vector.extract_strided_slice %10 {offsets = [0, 0], sizes = [16, 16], strides = [1, 1]} : vector<16x96xf32> to vector<16x16xf32>
    %14 = vector.shape_cast %13 : vector<16x16xf32> to vector<2x8x16xf32>
    %15 = vector.extract_strided_slice %10 {offsets = [0, 32], sizes = [16, 16], strides = [1, 1]} : vector<16x96xf32> to vector<16x16xf32>
    %16 = vector.shape_cast %15 : vector<16x16xf32> to vector<2x8x16xf32>
    %17 = vector.extract_strided_slice %10 {offsets = [0, 64], sizes = [16, 16], strides = [1, 1]} : vector<16x96xf32> to vector<16x16xf32>
    %18 = vector.shape_cast %17 : vector<16x16xf32> to vector<2x8x16xf32>
    "tpu.trace_start"() <{level = 10 : i32, message = "bqd,bkd->bqk"}> : () -> ()
    %cst_10 = arith.constant dense<0.000000e+00> : vector<2x8x8xf32>
    %19 = tpu.matmul %14, %16, %cst_10 {dimension_numbers = #tpu.dot_dimension_numbers<[2], [2], [1], [1], [0, 0, 0, 1, 1, 1], [0], [0]>} : vector<2x8x16xf32>, vector<2x8x16xf32>, vector<2x8x8xf32> -> vector<2x8x8xf32>
    "tpu.trace_stop"() : () -> ()
    %cst_11 = arith.constant 2.500000e-01 : f32
    %20 = vector.broadcast %cst_11 : f32 to vector<2x8x8xf32>
    %21 = arith.mulf %19, %20 : vector<2x8x8xf32>
    %22 = vector.broadcast %12 : vector<2x1x8xf32> to vector<2x8x8xf32>
    %23 = arith.addf %21, %22 : vector<2x8x8xf32>
    %cst_12 = arith.constant dense<0xFF800000> : vector<2x8xf32>
    %24 = vector.multi_reduction <maximumf>, %23, %cst_12 [2] : vector<2x8x8xf32> to vector<2x8xf32>
    %25 = vector.shape_cast %24 : vector<2x8xf32> to vector<2x8x1xf32>
    %26 = vector.broadcast %25 : vector<2x8x1xf32> to vector<2x8x8xf32>
    %27 = arith.subf %23, %26 : vector<2x8x8xf32>
    %28 = math.exp %27 : vector<2x8x8xf32>
    %cst_13 = arith.constant dense<0.000000e+00> : vector<2x8xf32>
    %29 = vector.multi_reduction <add>, %28, %cst_13 [2] : vector<2x8x8xf32> to vector<2x8xf32>
    %30 = vector.shape_cast %29 : vector<2x8xf32> to vector<2x8x1xf32>
    %31 = tpu.reciprocal %30 {approx = true} : vector<2x8x1xf32> -> vector<2x8x1xf32>
    %32 = vector.broadcast %31 : vector<2x8x1xf32> to vector<2x8x8xf32>
    %33 = arith.mulf %28, %32 : vector<2x8x8xf32>
    "tpu.trace_start"() <{level = 10 : i32, message = "bqk,bkd->bqd"}> : () -> ()
    %cst_14 = arith.constant dense<0.000000e+00> : vector<2x8x16xf32>
    %34 = tpu.matmul %33, %18, %cst_14 {dimension_numbers = #tpu.dot_dimension_numbers<[2], [1], [1], [2], [0, 0, 0, 1, 1, 2], [0], [0]>} : vector<2x8x8xf32>, vector<2x8x16xf32>, vector<2x8x16xf32> -> vector<2x8x16xf32>
    "tpu.trace_stop"() : () -> ()
    %35 = vector.extract_strided_slice %10 {offsets = [0, 16], sizes = [16, 16], strides = [1, 1]} : vector<16x96xf32> to vector<16x16xf32>
    %36 = vector.shape_cast %35 : vector<16x16xf32> to vector<2x8x16xf32>
    %37 = vector.extract_strided_slice %10 {offsets = [0, 48], sizes = [16, 16], strides = [1, 1]} : vector<16x96xf32> to vector<16x16xf32>
    %38 = vector.shape_cast %37 : vector<16x16xf32> to vector<2x8x16xf32>
    %39 = vector.extract_strided_slice %10 {offsets = [0, 80], sizes = [16, 16], strides = [1, 1]} : vector<16x96xf32> to vector<16x16xf32>
    %40 = vector.shape_cast %39 : vector<16x16xf32> to vector<2x8x16xf32>
    "tpu.trace_start"() <{level = 10 : i32, message = "bqd,bkd->bqk"}> : () -> ()
    %cst_15 = arith.constant dense<0.000000e+00> : vector<2x8x8xf32>
    %41 = tpu.matmul %36, %38, %cst_15 {dimension_numbers = #tpu.dot_dimension_numbers<[2], [2], [1], [1], [0, 0, 0, 1, 1, 1], [0], [0]>} : vector<2x8x16xf32>, vector<2x8x16xf32>, vector<2x8x8xf32> -> vector<2x8x8xf32>
    "tpu.trace_stop"() : () -> ()
    %cst_16 = arith.constant 2.500000e-01 : f32
    %42 = vector.broadcast %cst_16 : f32 to vector<2x8x8xf32>
    %43 = arith.mulf %41, %42 : vector<2x8x8xf32>
    %44 = vector.broadcast %12 : vector<2x1x8xf32> to vector<2x8x8xf32>
    %45 = arith.addf %43, %44 : vector<2x8x8xf32>
    %cst_17 = arith.constant dense<0xFF800000> : vector<2x8xf32>
    %46 = vector.multi_reduction <maximumf>, %45, %cst_17 [2] : vector<2x8x8xf32> to vector<2x8xf32>
    %47 = vector.shape_cast %46 : vector<2x8xf32> to vector<2x8x1xf32>
    %48 = vector.broadcast %47 : vector<2x8x1xf32> to vector<2x8x8xf32>
    %49 = arith.subf %45, %48 : vector<2x8x8xf32>
    %50 = math.exp %49 : vector<2x8x8xf32>
    %cst_18 = arith.constant dense<0.000000e+00> : vector<2x8xf32>
    %51 = vector.multi_reduction <add>, %50, %cst_18 [2] : vector<2x8x8xf32> to vector<2x8xf32>
    %52 = vector.shape_cast %51 : vector<2x8xf32> to vector<2x8x1xf32>
    %53 = tpu.reciprocal %52 {approx = true} : vector<2x8x1xf32> -> vector<2x8x1xf32>
    %54 = vector.broadcast %53 : vector<2x8x1xf32> to vector<2x8x8xf32>
    %55 = arith.mulf %50, %54 : vector<2x8x8xf32>
    "tpu.trace_start"() <{level = 10 : i32, message = "bqk,bkd->bqd"}> : () -> ()
    %cst_19 = arith.constant dense<0.000000e+00> : vector<2x8x16xf32>
    %56 = tpu.matmul %55, %40, %cst_19 {dimension_numbers = #tpu.dot_dimension_numbers<[2], [1], [1], [2], [0, 0, 0, 1, 1, 2], [0], [0]>} : vector<2x8x8xf32>, vector<2x8x16xf32>, vector<2x8x16xf32> -> vector<2x8x16xf32>
    "tpu.trace_stop"() : () -> ()
    %57 = tpu.concatenate %34, %56 in 2 : vector<2x8x16xf32>, vector<2x8x16xf32> -> vector<2x8x32xf32>
    %58 = vector.shape_cast %57 : vector<2x8x32xf32> to vector<16x32xf32>
    %c0_20 = arith.constant 0 : index
    %c0_21 = arith.constant 0 : index
    %c0_22 = arith.constant 0 : index
    %59 = vector.load %arg7[%c0_20, %c0_21, %c0_22] : memref<1x32x32xf32, #tpu.memory_space<vmem>>, vector<1x32x32xf32>
    %60 = vector.shape_cast %59 : vector<1x32x32xf32> to vector<32x32xf32>
    %cst_23 = arith.constant dense<0.000000e+00> : vector<16x32xf32>
    %61 = tpu.matmul %58, %60, %cst_23 {dimension_numbers = #tpu.dot_dimension_numbers<[1], [0], [0], [1], [0, 0, 1, 1], [], []>} : vector<16x32xf32>, vector<32x32xf32>, vector<16x32xf32> -> vector<16x32xf32>
    %c0_24 = arith.constant 0 : index
    %c0_25 = arith.constant 0 : index
    %c0_26 = arith.constant 0 : index
    %62 = vector.load %arg8[%c0_24, %c0_25, %c0_26] : memref<1x1x32xf32, #tpu.memory_space<vmem>>, vector<1x1x32xf32>
    %63 = vector.shape_cast %62 : vector<1x1x32xf32> to vector<1x32xf32>
    %64 = vector.broadcast %63 : vector<1x32xf32> to vector<16x32xf32>
    %65 = arith.addf %61, %64 : vector<16x32xf32>
    %66 = arith.addf %65, %3 : vector<16x32xf32>
    %c0_27 = arith.constant 0 : index
    %c0_28 = arith.constant 0 : index
    %c0_29 = arith.constant 0 : index
    %67 = vector.load %arg9[%c0_27, %c0_28, %c0_29] : memref<1x1x32xf32, #tpu.memory_space<vmem>>, vector<1x1x32xf32>
    %68 = vector.shape_cast %67 : vector<1x1x32xf32> to vector<1x32xf32>
    %c0_30 = arith.constant 0 : index
    %c0_31 = arith.constant 0 : index
    %c0_32 = arith.constant 0 : index
    %69 = vector.load %arg10[%c0_30, %c0_31, %c0_32] : memref<1x1x32xf32, #tpu.memory_space<vmem>>, vector<1x1x32xf32>
    %70 = vector.shape_cast %69 : vector<1x1x32xf32> to vector<1x32xf32>
    %cst_33 = arith.constant dense<0.000000e+00> : vector<16xf32>
    %71 = vector.multi_reduction <add>, %66, %cst_33 [1] : vector<16x32xf32> to vector<16xf32>
    %72 = vector.shape_cast %71 : vector<16xf32> to vector<16x1xf32>
    %cst_34 = arith.constant 3.200000e+01 : f32
    %73 = vector.broadcast %cst_34 : f32 to vector<16x1xf32>
    %74 = arith.divf %72, %73 : vector<16x1xf32>
    %75 = vector.broadcast %74 : vector<16x1xf32> to vector<16x32xf32>
    %76 = arith.subf %66, %75 : vector<16x32xf32>
    %77 = vector.broadcast %74 : vector<16x1xf32> to vector<16x32xf32>
    %78 = arith.subf %66, %77 : vector<16x32xf32>
    %79 = arith.mulf %76, %78 : vector<16x32xf32>
    %cst_35 = arith.constant dense<0.000000e+00> : vector<16xf32>
    %80 = vector.multi_reduction <add>, %79, %cst_35 [1] : vector<16x32xf32> to vector<16xf32>
    %81 = vector.shape_cast %80 : vector<16xf32> to vector<16x1xf32>
    %cst_36 = arith.constant 3.200000e+01 : f32
    %82 = vector.broadcast %cst_36 : f32 to vector<16x1xf32>
    %83 = arith.divf %81, %82 : vector<16x1xf32>
    %84 = vector.broadcast %74 : vector<16x1xf32> to vector<16x32xf32>
    %85 = arith.subf %66, %84 : vector<16x32xf32>
    %cst_37 = arith.constant 9.99999996E-13 : f32
    %86 = vector.broadcast %cst_37 : f32 to vector<16x1xf32>
    %87 = arith.addf %83, %86 : vector<16x1xf32>
    %88 = math.rsqrt %87 : vector<16x1xf32>
    %89 = vector.broadcast %88 : vector<16x1xf32> to vector<16x32xf32>
    %90 = arith.mulf %85, %89 : vector<16x32xf32>
    %91 = vector.broadcast %68 : vector<1x32xf32> to vector<16x32xf32>
    %92 = arith.mulf %90, %91 : vector<16x32xf32>
    %93 = vector.broadcast %70 : vector<1x32xf32> to vector<16x32xf32>
    %94 = arith.addf %92, %93 : vector<16x32xf32>
    %c0_38 = arith.constant 0 : index
    %c0_39 = arith.constant 0 : index
    %c0_40 = arith.constant 0 : index
    %95 = vector.load %arg11[%c0_38, %c0_39, %c0_40] : memref<1x32x64xf32, #tpu.memory_space<vmem>>, vector<1x32x64xf32>
    %96 = vector.shape_cast %95 : vector<1x32x64xf32> to vector<32x64xf32>
    %cst_41 = arith.constant dense<0.000000e+00> : vector<16x64xf32>
    %97 = tpu.matmul %94, %96, %cst_41 {dimension_numbers = #tpu.dot_dimension_numbers<[1], [0], [0], [1], [0, 0, 1, 1], [], []>} : vector<16x32xf32>, vector<32x64xf32>, vector<16x64xf32> -> vector<16x64xf32>
    %c0_42 = arith.constant 0 : index
    %c0_43 = arith.constant 0 : index
    %c0_44 = arith.constant 0 : index
    %98 = vector.load %arg12[%c0_42, %c0_43, %c0_44] : memref<1x1x64xf32, #tpu.memory_space<vmem>>, vector<1x1x64xf32>
    %99 = vector.shape_cast %98 : vector<1x1x64xf32> to vector<1x64xf32>
    %100 = vector.broadcast %99 : vector<1x64xf32> to vector<16x64xf32>
    %101 = arith.addf %97, %100 : vector<16x64xf32>
    %cst_45 = arith.constant 5.000000e-01 : f32
    %102 = vector.broadcast %cst_45 : f32 to vector<16x64xf32>
    %103 = arith.mulf %102, %101 : vector<16x64xf32>
    %cst_46 = arith.constant 4.471500e-02 : f32
    %104 = vector.broadcast %cst_46 : f32 to vector<16x64xf32>
    %105 = arith.mulf %104, %101 : vector<16x64xf32>
    %106 = arith.mulf %105, %101 : vector<16x64xf32>
    %107 = arith.mulf %106, %101 : vector<16x64xf32>
    %108 = arith.addf %101, %107 : vector<16x64xf32>
    %cst_47 = arith.constant 0.797884583 : f32
    %109 = vector.broadcast %cst_47 : f32 to vector<16x64xf32>
    %110 = arith.mulf %109, %108 : vector<16x64xf32>
    %111 = math.tanh %110 : vector<16x64xf32>
    %cst_48 = arith.constant 1.000000e+00 : f32
    %112 = vector.broadcast %cst_48 : f32 to vector<16x64xf32>
    %113 = arith.addf %112, %111 : vector<16x64xf32>
    %114 = arith.mulf %103, %113 : vector<16x64xf32>
    %c0_49 = arith.constant 0 : index
    %c0_50 = arith.constant 0 : index
    %c0_51 = arith.constant 0 : index
    %115 = vector.load %arg13[%c0_49, %c0_50, %c0_51] : memref<1x64x32xf32, #tpu.memory_space<vmem>>, vector<1x64x32xf32>
    %116 = vector.shape_cast %115 : vector<1x64x32xf32> to vector<64x32xf32>
    %cst_52 = arith.constant dense<0.000000e+00> : vector<16x32xf32>
    %117 = tpu.matmul %114, %116, %cst_52 {dimension_numbers = #tpu.dot_dimension_numbers<[1], [0], [0], [1], [0, 0, 1, 1], [], []>} : vector<16x64xf32>, vector<64x32xf32>, vector<16x32xf32> -> vector<16x32xf32>
    %c0_53 = arith.constant 0 : index
    %c0_54 = arith.constant 0 : index
    %c0_55 = arith.constant 0 : index
    %118 = vector.load %arg14[%c0_53, %c0_54, %c0_55] : memref<1x1x32xf32, #tpu.memory_space<vmem>>, vector<1x1x32xf32>
    %119 = vector.shape_cast %118 : vector<1x1x32xf32> to vector<1x32xf32>
    %120 = vector.broadcast %119 : vector<1x32xf32> to vector<16x32xf32>
    %121 = arith.addf %117, %120 : vector<16x32xf32>
    %122 = arith.addf %121, %94 : vector<16x32xf32>
    %c0_56 = arith.constant 0 : index
    %c0_57 = arith.constant 0 : index
    %c0_58 = arith.constant 0 : index
    %123 = vector.load %arg15[%c0_56, %c0_57, %c0_58] : memref<1x1x32xf32, #tpu.memory_space<vmem>>, vector<1x1x32xf32>
    %124 = vector.shape_cast %123 : vector<1x1x32xf32> to vector<1x32xf32>
    %c0_59 = arith.constant 0 : index
    %c0_60 = arith.constant 0 : index
    %c0_61 = arith.constant 0 : index
    %125 = vector.load %arg16[%c0_59, %c0_60, %c0_61] : memref<1x1x32xf32, #tpu.memory_space<vmem>>, vector<1x1x32xf32>
    %126 = vector.shape_cast %125 : vector<1x1x32xf32> to vector<1x32xf32>
    %cst_62 = arith.constant dense<0.000000e+00> : vector<16xf32>
    %127 = vector.multi_reduction <add>, %122, %cst_62 [1] : vector<16x32xf32> to vector<16xf32>
    %128 = vector.shape_cast %127 : vector<16xf32> to vector<16x1xf32>
    %cst_63 = arith.constant 3.200000e+01 : f32
    %129 = vector.broadcast %cst_63 : f32 to vector<16x1xf32>
    %130 = arith.divf %128, %129 : vector<16x1xf32>
    %131 = vector.broadcast %130 : vector<16x1xf32> to vector<16x32xf32>
    %132 = arith.subf %122, %131 : vector<16x32xf32>
    %133 = vector.broadcast %130 : vector<16x1xf32> to vector<16x32xf32>
    %134 = arith.subf %122, %133 : vector<16x32xf32>
    %135 = arith.mulf %132, %134 : vector<16x32xf32>
    %cst_64 = arith.constant dense<0.000000e+00> : vector<16xf32>
    %136 = vector.multi_reduction <add>, %135, %cst_64 [1] : vector<16x32xf32> to vector<16xf32>
    %137 = vector.shape_cast %136 : vector<16xf32> to vector<16x1xf32>
    %cst_65 = arith.constant 3.200000e+01 : f32
    %138 = vector.broadcast %cst_65 : f32 to vector<16x1xf32>
    %139 = arith.divf %137, %138 : vector<16x1xf32>
    %140 = vector.broadcast %130 : vector<16x1xf32> to vector<16x32xf32>
    %141 = arith.subf %122, %140 : vector<16x32xf32>
    %cst_66 = arith.constant 9.99999996E-13 : f32
    %142 = vector.broadcast %cst_66 : f32 to vector<16x1xf32>
    %143 = arith.addf %139, %142 : vector<16x1xf32>
    %144 = math.rsqrt %143 : vector<16x1xf32>
    %145 = vector.broadcast %144 : vector<16x1xf32> to vector<16x32xf32>
    %146 = arith.mulf %141, %145 : vector<16x32xf32>
    %147 = vector.broadcast %124 : vector<1x32xf32> to vector<16x32xf32>
    %148 = arith.mulf %146, %147 : vector<16x32xf32>
    %149 = vector.broadcast %126 : vector<1x32xf32> to vector<16x32xf32>
    %150 = arith.addf %148, %149 : vector<16x32xf32>
    %c0_67 = arith.constant 0 : index
    %c0_68 = arith.constant 0 : index
    %151 = vector.load %arg17[%c0_67, %c0_68] : memref<16x32xf32, #tpu.memory_space<vmem>>, vector<16x32xf32>
    tpu.vector_store %arg17[%c0_67, %c0_68], %150 {strides = array<i32>} : memref<16x32xf32, #tpu.memory_space<vmem>>, vector<16x32xf32>,
    return
  }
  func.func @transform_0(%arg0: i32) -> (i32, i32) {
    %c0_i32 = arith.constant 0 : i32
    %c0_i32_0 = arith.constant 0 : i32
    %c0_i32_1 = arith.constant 0 : i32
    return %c0_i32, %c0_i32_0 : i32, i32
  }
  func.func @transform_1(%arg0: i32) -> (i32, i32) {
    %c0_i32 = arith.constant 0 : i32
    %c0_i32_0 = arith.constant 0 : i32
    %c0_i32_1 = arith.constant 0 : i32
    return %c0_i32, %c0_i32_0 : i32, i32
  }
  func.func @transform_2(%arg0: i32) -> (i32, i32) {
    %c0_i32 = arith.constant 0 : i32
    %c0_i32_0 = arith.constant 0 : i32
    %c0_i32_1 = arith.constant 0 : i32
    return %c0_i32, %c0_i32_0 : i32, i32
  }
  func.func @transform_3(%arg0: i32) -> (i32, i32) {
    %c0_i32 = arith.constant 0 : i32
    %c0_i32_0 = arith.constant 0 : i32
    %c0_i32_1 = arith.constant 0 : i32
    return %c0_i32, %c0_i32_0 : i32, i32
  }
  func.func @transform_4(%arg0: i32) -> (i32, i32, i32) {
    %c0_i32 = arith.constant 0 : i32
    %c0_i32_0 = arith.constant 0 : i32
    %c0_i32_1 = arith.constant 0 : i32
    return %arg0, %c0_i32, %c0_i32_0 : i32, i32, i32
  }
  func.func @transform_5(%arg0: i32) -> (i32, i32, i32) {
    %c0_i32 = arith.constant 0 : i32
    %c0_i32_0 = arith.constant 0 : i32
    %c0_i32_1 = arith.constant 0 : i32
    return %arg0, %c0_i32, %c0_i32_0 : i32, i32, i32
  }
  func.func @transform_6(%arg0: i32) -> (i32, i32, i32) {
    %c0_i32 = arith.constant 0 : i32
    %c0_i32_0 = arith.constant 0 : i32
    %c0_i32_1 = arith.constant 0 : i32
    return %arg0, %c0_i32, %c0_i32_0 : i32, i32, i32
  }
  func.func @transform_7(%arg0: i32) -> (i32, i32, i32) {
    %c0_i32 = arith.constant 0 : i32
    %c0_i32_0 = arith.constant 0 : i32
    %c0_i32_1 = arith.constant 0 : i32
    return %arg0, %c0_i32, %c0_i32_0 : i32, i32, i32
  }
  func.func @transform_8(%arg0: i32) -> (i32, i32, i32) {
    %c0_i32 = arith.constant 0 : i32
    %c0_i32_0 = arith.constant 0 : i32
    %c0_i32_1 = arith.constant 0 : i32
    return %arg0, %c0_i32, %c0_i32_0 : i32, i32, i32
  }
  func.func @transform_9(%arg0: i32) -> (i32, i32, i32) {
    %c0_i32 = arith.constant 0 : i32
    %c0_i32_0 = arith.constant 0 : i32
    %c0_i32_1 = arith.constant 0 : i32
    return %arg0, %c0_i32, %c0_i32_0 : i32, i32, i32
  }
  func.func @transform_10(%arg0: i32) -> (i32, i32, i32) {
    %c0_i32 = arith.constant 0 : i32
    %c0_i32_0 = arith.constant 0 : i32
    %c0_i32_1 = arith.constant 0 : i32
    return %arg0, %c0_i32, %c0_i32_0 : i32, i32, i32
  }
  func.func @transform_11(%arg0: i32) -> (i32, i32, i32) {
    %c0_i32 = arith.constant 0 : i32
    %c0_i32_0 = arith.constant 0 : i32
    %c0_i32_1 = arith.constant 0 : i32
    return %arg0, %c0_i32, %c0_i32_0 : i32, i32, i32
  }
  func.func @transform_12(%arg0: i32) -> (i32, i32, i32) {
    %c0_i32 = arith.constant 0 : i32
    %c0_i32_0 = arith.constant 0 : i32
    %c0_i32_1 = arith.constant 0 : i32
    return %arg0, %c0_i32, %c0_i32_0 : i32, i32, i32
  }
  func.func @transform_13(%arg0: i32) -> (i32, i32, i32) {
    %c0_i32 = arith.constant 0 : i32
    %c0_i32_0 = arith.constant 0 : i32
    %c0_i32_1 = arith.constant 0 : i32
    return %arg0, %c0_i32, %c0_i32_0 : i32, i32, i32
  }
  func.func @transform_14(%arg0: i32) -> (i32, i32, i32) {
    %c0_i32 = arith.constant 0 : i32
    %c0_i32_0 = arith.constant 0 : i32
    %c0_i32_1 = arith.constant 0 : i32
    return %arg0, %c0_i32, %c0_i32_0 : i32, i32, i32
  }
  func.func @transform_15(%arg0: i32) -> (i32, i32, i32) {
    %c0_i32 = arith.constant 0 : i32
    %c0_i32_0 = arith.constant 0 : i32
    %c0_i32_1 = arith.constant 0 : i32
    return %arg0, %c0_i32, %c0_i32_0 : i32, i32, i32
  }
  func.func @transform_16(%arg0: i32) -> (i32, i32) {
    %c0_i32 = arith.constant 0 : i32
    %c0_i32_0 = arith.constant 0 : i32
    %c0_i32_1 = arith.constant 0 : i32
    return %c0_i32, %c0_i32_0 : i32, i32
  }
}

</mosaic_0001>

<bundles_post_ra>
// kernel: bert_forward.1
= control target key start
LH: loop header
LB: loop body
LE: loop exit
PB: predicated region body
PF: predicated region fallthrough
CT: control target
= control target key end

     0   :  { %s2447_s21 = smov 0   ;;  %s2713_s0 = inlined_call_operand.vmem [shape: f32[16,32], index: 0, kind: input, shape index: {}]   ;;  %s2714_s1 = inlined_call_operand.vmem [shape: f32[2,8], index: 1, kind: input, shape index: {}]   ;;  %s2715_s2 = inlined_call_operand.vmem [shape: f32[1,32], index: 2, kind: input, shape index: {}]   ;;  %s2716_s3 = inlined_call_operand.vmem [shape: f32[1,32], index: 3, kind: input, shape index: {}]   ;;  %s2717_s4 = inlined_call_operand.vmem [shape: f32[2,32,96], index: 4, kind: input, shape index: {}]   ;;  %s2718_s5 = inlined_call_operand.vmem [shape: f32[2,1,96], index: 5, kind: input, shape index: {}]   ;;  %s2719_s6 = inlined_call_operand.vmem [shape: f32[2,32,32], index: 6, kind: input, shape index: {}]   ;;  %s2720_s7 = inlined_call_operand.vmem [shape: f32[2,1,32], index: 7, kind: input, shape index: {}]   ;;  %s2721_s8 = inlined_call_operand.vmem [shape: f32[2,1,32], index: 8, kind: input, shape index: {}]   ;;  %s2722_s9 = inlined_call_operand.vmem [shape: f32[2,1,32], index: 9, kind: input, shape index: {}]   ;;  %s2723_s10 = inlined_call_operand.vmem [shape: f32[2,32,64], index: 10, kind: input, shape index: {}]   ;;  %s2724_s11 = inlined_call_operand.vmem [shape: f32[2,1,64], index: 11, kind: input, shape index: {}]   ;;  %s2725_s12 = inlined_call_operand.vmem [shape: f32[2,64,32], index: 12, kind: input, shape index: {}]   ;;  %s2726_s13 = inlined_call_operand.vmem [shape: f32[2,1,32], index: 13, kind: input, shape index: {}]   ;;  %s2727_s14 = inlined_call_operand.vmem [shape: f32[2,1,32], index: 14, kind: input, shape index: {}]   ;;  %s2728_s15 = inlined_call_operand.vmem [shape: f32[2,1,32], index: 15, kind: input, shape index: {}]   ;;  %s2729_s16 = inlined_call_operand.vmem [shape: f32[16,32], index: 16, kind: output, shape index: {}]  }
   0x1   :  { %2735 = sst [smem:[#allocation4_spill]] %s2713_s0 }
   0x2   :  { %2736 = sst [smem:[#allocation5_spill]] %s2714_s1 }
   0x3   :  { %2737 = sst [smem:[#allocation6_spill]] %s2716_s3 }
   0x4   :  { %2738 = sst [smem:[#allocation7_spill]] %s2717_s4 }
   0x5   :  { %2739 = sst [smem:[#allocation8_spill]] %s2719_s6 }
   0x6   :  { %2740 = sst [smem:[#allocation9_spill]] %s2729_s16 }
   0x7 LB: > { %2741 = sst [smem:[#allocation2_spill]] %s2351_s21  ;;  %s2070_s22 = sadd.s32 4294967295, %s2351_s21   ;;  %s2351_s21 = sphi %s2447_s21, %s26_s21  }
   0x8   : > { %p2073_p0 = scmp.ge.s32.totalorder %s2351_s21, 1  ;;  %p551_p1 = scmp.lt.s32.totalorder %s2351_s21, 3 }
   0xa   : > { %p552_p2 = pnand %p2073_p0, %p551_p1 }
   0xc   : > { %555 = sbr.rel (%p552_p2) target bundleno = 3397 (0xd45), region = 84 }
  0x13   : > { %p635_p3 = scmp.lt.s32.totalorder %s2070_s22, 1  ;;  %s2742_s4 = sld [smem:[#allocation7_spill]] }
  0x14   : > { %s2743_s6 = sld [smem:[#allocation8_spill]]  ;;  %p2082_p4 = scmp.ne.s32.totalorder %s2070_s22, 0 }
  0x15   : > { %s2455_s23 = scalar_select %p635_p3, %s2070_s22, 1 }
  0x16   : > { %682 = sbr.rel (%p2082_p4) target bundleno = 351 (0x15f), region = 88  ;;  %vm687_vm0 = vcmask (!%p2082_p4), 261120   ;;  %v2083_v21 = vld [vmem:[%s2715_s2] ss:$0 sm:$0xff] (!%p2082_p4)  ;;  %s2746_s16 = sld [smem:[#allocation6_spill]] (!%p2082_p4) }
  0x17   : > { %s2116_s24 = sshll.u32 %s2455_s23, 5  ;;  %s672_s25 = scalar_lea.vmem %s2726_s13, %s2455_s23 }
  0x18   : > { %s675_s28 = scalar_lea.vmem %s2727_s14, %s2455_s23  ;;  %s678_s3 = scalar_lea.vmem %s2728_s15, %s2455_s23 }
  0x19   : > { %s2465_s30 = scalar_lea.vmem %s2742_s4, %s2116_s24  ;;  %s2487_s4 = scalar_lea.vmem %s2723_s10, %s2116_s24 }
  0x1a   : > { %s2470_s18 = scalar_lea.vmem %s2743_s6, %s2116_s24  ;;  %s2745_s6 = sld [smem:[#allocation4_spill]] (!%p2082_p4) }
  0x1b   : > { %2744 = sst [smem:[#allocation3_spill]] %s2470_s18  ;;  %s2119_s18 = sshll.u32 %s2455_s23, 6 }
  0x1c   : > { %s2497_s21 = scalar_lea.vmem %s2725_s12, %s2119_s18  ;;  %v2084_v23 = vld [vmem:[%s2746_s16] ss:$0 sm:$0xff] (!%p2082_p4)  ;;  %s2747_s29 = sld [smem:[#allocation9_spill]] (!%p2082_p4) }
  0x20   : > { %v683_v0 = vld [vmem:[%s2745_s6] sm:$0xff]  ;;  %v684_v1 = vld [vmem:[%s2745_s6 + $0x8] sm:$0xff] }
  0x21   : > { %v688_v2 = vsel %vm687_vm0, %v683_v0, 0.0  ;;  %v691_v3 = vsel %vm687_vm0, %v684_v1, 0.0 }
  0x22   : > { %689 = vadd.xlane.f32.xlu0 %v688_v2 }
  0x26   : > { %692 = vadd.xlane.f32.xlu0 %v691_v3 }
  0xaf   : > { %v690_v4 = vpop.xlane.xlu0 %689 }
  0xb0   : > { %v695_v5 = vmul.f32 0.03125, %v690_v4 }
  0xb2   : > { %v697_v6 = vsub.f32 %v683_v0, %v695_v5 }
  0xb3   : > { %v693_v7 = vpop.xlane.xlu0 %692 }
  0xb4   : > { %v696_v8 = vmul.f32 0.03125, %v693_v7  ;;  %v699_v9 = vmul.f32 %v697_v6, %v697_v6 }
  0xb6   : > { %v698_v10 = vsub.f32 %v684_v1, %v696_v8  ;;  %v701_v11 = vsel %vm687_vm0, %v699_v9, 0.0 }
  0xb7   : > { %702 = vadd.xlane.f32.xlu1 %v701_v11 }
  0xb8   : > { %v700_v12 = vmul.f32 %v698_v10, %v698_v10 }
  0xba   : > { %v704_v13 = vsel %vm687_vm0, %v700_v12, 0.0 }
  0xbb   : > { %705 = vadd.xlane.f32.xlu1 %v704_v13 }
 0x144   : > { %v703_v14 = vpop.xlane.xlu1 %702 }
 0x145   : > { %v707_v15 = vmul.f32 0.03125, %v703_v14 }
 0x147   : > { %v709_v16 = vadd.f32 1e-12, %v707_v15 }
 0x148   : > { %v706_v17 = vpop.xlane.xlu1 %705 }
 0x149   : > { %2313 = vrsqrt.f32 %v709_v16  ;;  %v708_v18 = vmul.f32 0.03125, %v706_v17 }
 0x14b   : > { %v710_v19 = vadd.f32 1e-12, %v708_v18 }
 0x14d   : > { %2315 = vrsqrt.f32 %v710_v19 }
 0x153   : > { %v2314_v20 = vpop.eup %2313 }
 0x154   : > { %v713_v22 = vmul.f32 %v2314_v20, %v697_v6 }
 0x156   : > { %v721_v24 = vmul.f32 %v2083_v21, %v713_v22 }
 0x157   : > { %v2316_v25 = vpop.eup %2315 }
 0x158   : > { %v729_v26 = vadd.f32 %v2084_v23, %v721_v24  ;;  %v714_v27 = vmul.f32 %v2316_v25, %v698_v10 }
 0x15a   : > { %731 = vst.msk [vmem:[%s2747_s29] sm:$0xff] %vm687_vm0, %v729_v26  ;;  %v722_v28 = vmul.f32 %v2083_v21, %v714_v27 }
 0x15c   : > { %v730_v29 = vadd.f32 %v2084_v23, %v722_v28 }
 0x15e   : > { %732 = vst.msk [vmem:[%s2747_s29 + $0x8] sm:$0xff] %vm687_vm0, %v730_v29 }
 0x15f PF: > { %v735_v30 = vld [vmem:[%s2465_s30] sm:$0xff]  ;;  %v736_v31 = vld [vmem:[%s2465_s30 + $0x8] sm:$0xff]  ;;  %v737_v32 = vld [vmem:[%s2465_s30 + $0x10] sm:$0xff]  ;;  %vm746_vm1 = vcmask 261120   ;;  %s2748_s22 = sld [smem:[#allocation9_spill]]  ;;  %v2353_v38 = vmov 0.0   ;;  %s2749_s16 = scalar_lea.vmem %s2718_s5, %s2455_s23  ;;  %v841_v48 = vlaneseq }
 0x160   : > { %v2256_v33 = vpack.c.bf16 %v736_v31, %v735_v30  ;;  %v738_v34 = vld [vmem:[%s2465_s30 + $0x18] sm:$0xff]  ;;  %2185 = vmatprep.subr.mxu0 %v2353_v38  ;;  %vm2354_vm2 = vmmov 0   ;;  %v2085_v39 = vld [vmem:[%s2749_s16] ss:$0 sm:$0xff]  ;;  %s2355_s26 = smov 96   ;;  %vm855_vm3 = vcmask 130048  }
 0x161   : > { %v2260_v36 = vpack.c.bf16 %v738_v34, %v737_v32  ;;  %2187 = vmatprep.mubr.msk.f32.mxu0 %vm2354_vm2, %v2353_v38  ;;  %v2356_v46 = vmov 1966171168   ;;  %v842_v50 = vshrl.u32 %v841_v48, 7  ;;  %s2750_s0 = sld [smem:[#allocation5_spill]]  ;;  %vm1021_vm4 = vcmask 64512   ;;  %s2357_s17 = smov 64  }
 0x162   : > { %2257 = vmatprep.subr.bf16.mxu1 %v2256_v33  ;;  %v839_v47 = vunpack.c.l.s4 %v2356_v46  ;;  %s2358_s18 = smov 80   ;;  %s2359_s19 = smov 112   ;;  %vm1804_vm5 = vcmask 523264  }
 0x163   : > { %2259 = vmatpush3.bf16.msra.mxu1 %v2256_v33  ;;  %v1011_v55 = vsub.s32 0, %v842_v50  ;;  %s2360_s27 = smov 48   ;;  %s2751_s20 = sld [smem:[#allocation3_spill]] }
 0x164   : > { %2261 = vmatprep.subr.bf16.mxu1 %v2260_v36  ;;  %v840_v49 = vunpack.c.0.s8 %v839_v47  ;;  %s2361_s30 = smov 16  }
 0x165   : > { %v2542_v35 = vld [vmem:[%s2748_s22] sm:$0xff]  ;;  %v2549_v37 = vld [vmem:[%s2748_s22 + $0x8] sm:$0xff] }
 0x166   : > { %2172 = vmatprep.mubr.msk.f32.mxu1 %vm746_vm1, %v2542_v35  ;;  %v843_v51 = vsub.s32 %v840_v49, %v842_v50 }
 0x167   : > { %2263 = vmatpush3.bf16.msra.mxu1 %v2260_v36  ;;  %v2088_v52 = vld.sshfl [vmem:[%s2750_s0] sm:$0x11 pattern:$0x75316420]  ;;  %s2753_s0 = scalar_lea.vmem %s2721_s8, %s2455_s23 }
 0x168   : > { %2175 = vmatprep.subr.mxu1 %v2353_v38  ;;  %v837_v53 = vcombine.high %v2088_v52, %v2088_v52  ;;  %v844_v54 = vrot.slane %v2088_v52, %v843_v51 }
 0x16a   : > { %2173 = vmatmul.mubr.msk.f32.vlgmr.msra.gmra.mrb[0].mxu1 %vm746_vm1, %v2549_v37  ;;  %v2585_v56 = vrot.slane %v844_v54, %v1011_v55  ;;  %v851_v57 = vrot.slane %v837_v53, %v843_v51 }
 0x16b   : > { %2177 = vmatprep.mubr.msk.f32.mxu1 %vm2354_vm2, %v2353_v38 }
 0x16c   : > { %v2588_v62 = vrot.slane %v851_v57, %v1011_v55 }
 0x23d   : > { %v2174_v40 = vpop.f32.mrb[0].mxu1 }
 0x23e   : > { %v819_v41 = vpop.f32.mrb[1].mxu1  ;;  %v2567_v43 = vadd.f32 %v2174_v40, %v2085_v39 }
 0x23f   : > { %v2564_v42 = vadd.f32 %v2085_v39, %v819_v41 }
 0x241   : > { %853 = vrot.lane.b32.xlu0 %v2564_v42, %s2355_s26 }
 0x245   : > { %931 = vrot.lane.b32.xlu0 %v2567_v43, %s2355_s26  ;;  %s2752_s26 = scalar_lea.vmem %s2720_s7, %s2455_s23 }
 0x2b3   : > { %v854_v44 = vpop.permute.xlu0 %853 }
 0x2b4   : > { %2176 = vmatpush3.xpose.msk.msra.mxu1 %vm855_vm3, %v854_v44 }
 0x2b5   : > { %2180 = vmatprep.subr.mxu1 %v2353_v38 }
 0x2b7   : > { %2178 = vmatmul.mubr.msk.f32.vlgmr.msra.gmra.mrb[2].mxu1 %vm855_vm3, %v2564_v42  ;;  %v932_v45 = vpop.permute.xlu0 %931 }
 0x2b8   : > { %2181 = vmatpush3.xpose.msk.msra.mxu1 %vm855_vm3, %v932_v45  ;;  %2182 = vmatprep.mubr.msk.f32.mxu1 %vm2354_vm2, %v2353_v38 }
 0x2b9   : > { %2190 = vmatprep.subr.mxu1 %v2353_v38 }
 0x2bb   : > { %2183 = vmatmul.mubr.msk.f32.vlgmr.msra.gmra.mrb[4].mxu1 %vm855_vm3, %v2567_v43 }
 0x2bc   : > { %2192 = vmatprep.mubr.msk.f32.mxu1 %vm2354_vm2, %v2353_v38 }
 0x38a   : > { %v926_v58 = vpop.f32.mrb[2].mxu1 }
 0x38b   : > { %v1007_v59 = vmul.f32 0.25, %v926_v58  ;;  %v2179_v60 = vpop.f32.mrb[3].mxu1 }
 0x38d   : > { %v1019_v61 = vadd.f32 %v2585_v56, %v1007_v59 }
 0x38e   : > { %v1003_v63 = vpop.f32.mrb[4].mxu1 }
 0x38f   : > { %v1008_v0 = vmul.f32 0.25, %v1003_v63  ;;  %v2184_v1 = vpop.f32.mrb[5].mxu1  ;;  %v1022_v2 = vsel %vm1021_vm4, %v1019_v61, -inf  ;;  %v1541_v63 = vld [vmem:[%s2751_s20 + $0x8] sm:$0xff] }
 0x390   : > { %1023 = vmax.xlane.f32.xlu1 %v1022_v2  ;;  %v1543_v1 = vld [vmem:[%s2751_s20 + $0x18] sm:$0xff] }
 0x391   : > { %v1020_v3 = vadd.f32 %v2588_v62, %v1008_v0 }
 0x393   : > { %v1025_v4 = vsel %vm1021_vm4, %v1020_v3, -inf }
 0x394   : > { %1026 = vmax.xlane.f32.xlu1 %v1025_v4 }
 0x3a5   : > { %1044 = vrot.lane.b32.xlu1 %v2564_v42, %s2357_s17 }
 0x3a9   : > { %1120 = vrot.lane.b32.xlu1 %v2567_v43, %s2357_s17 }
 0x3ad   : > { %1198 = vrot.lane.b32.xlu1 %v2564_v42, %s2358_s18 }
 0x3b1   : > { %1276 = vrot.lane.b32.xlu1 %v2567_v43, %s2358_s18  ;;  %s2754_s18 = scalar_lea.vmem %s2722_s9, %s2455_s23 }
 0x41d   : > { %v1024_v5 = vpop.xlane.xlu1 %1023 }
 0x41e   : > { %v1028_v6 = vsub.f32 %v1019_v61, %v1024_v5 }
 0x420   : > { %v1030_v7 = vmul.f32 1.442695, %v1028_v6 }
 0x421   : > { %v1027_v8 = vpop.xlane.xlu1 %1026 }
 0x422   : > { %2317 = vpow2.f32 %v1030_v7  ;;  %v1029_v9 = vsub.f32 %v1020_v3, %v1027_v8 }
 0x424   : > { %v1032_v10 = vmul.f32 1.442695, %v1029_v9 }
 0x425   : > { %v1045_v11 = vpop.permute.xlu1 %1044 }
 0x426   : > { %2319 = vpow2.f32 %v1032_v10  ;;  %2186 = vmatpush3.msra.mxu0 %v1045_v11  ;;  %v2101_v11 = vld [vmem:[%s2752_s26] ss:$0 sm:$0xff] }
 0x427   : > { %2195 = vmatprep.subr.mxu0 %v2353_v38 }
 0x429   : > { %v1121_v12 = vpop.permute.xlu1 %1120 }
 0x42a   : > { %2191 = vmatpush3.msra.mxu1 %v1121_v12 }
 0x42b   : > { %2200 = vmatprep.subr.mxu1 %v2353_v38 }
 0x42c   : > { %v2318_v13 = vpop.eup %2317 }
 0x42d   : > { %v1034_v14 = vsel %vm1021_vm4, %v2318_v13, 0.0  ;;  %v1199_v17 = vpop.permute.xlu1 %1198 }
 0x42e   : > { %1035 = vadd.xlane.f32.xlu0 %v1034_v14 }
 0x430   : > { %v2320_v15 = vpop.eup %2319 }
 0x431   : > { %v1037_v16 = vsel %vm1021_vm4, %v2320_v15, 0.0  ;;  %v1277_v18 = vpop.permute.xlu1 %1276 }
 0x432   : > { %1038 = vadd.xlane.f32.xlu1 %v1037_v16 }
 0x443   : > { %1274 = vrot.lane.b32.xlu1 %v2567_v43, %s2359_s19 }
 0x444   : > { %1196 = vrot.lane.b32.xlu0 %v2564_v42, %s2359_s19 }
 0x4bb   : > { %v1036_v19 = vpop.xlane.xlu0 %1035 }
 0x4bc   : > { %2321 = vrcp.f32 %v1036_v19 }
 0x4bf   : > { %v1039_v20 = vpop.xlane.xlu1 %1038  ;;  %v1197_v25 = vpop.permute.xlu0 %1196 }
 0x4c0   : > { %2323 = vrcp.f32 %v1039_v20 }
 0x4c3   : > { %v1275_v26 = vpop.permute.xlu1 %1274 }
 0x4c6   : > { %v2322_v21 = vpop.eup %2321 }
 0x4c7   : > { %v1042_v22 = vmul.f32 %v2322_v21, %v2318_v13 }
 0x4c9   : > { %2188 = vmatmul.mubr.msk.f32.vlgmr.msra.gmra.mrb[0].mxu0 %vm1021_vm4, %v1042_v22 }
 0x4ca   : > { %v2324_v23 = vpop.eup %2323  ;;  %2196 = vmatpush3.xpose.msk.msra.mxu0 %vm855_vm3, %v1199_v17  ;;  %2197 = vmatprep.mubr.msk.f32.mxu0 %vm2354_vm2, %v2353_v38 }
 0x4cb   : > { %v1043_v24 = vmul.f32 %v2324_v23, %v2320_v15  ;;  %2205 = vmatprep.subr.mxu0 %v2353_v38 }
 0x4cd   : > { %2193 = vmatmul.mubr.msk.f32.vlgmr.msra.gmra.mrb[6].mxu1 %vm1021_vm4, %v1043_v24  ;;  %2198 = vmatmul.mubr.msk.f32.vlgmr.msra.gmra.mrb[2].mxu0 %vm855_vm3, %v1197_v25 }
 0x4ce   : > { %2201 = vmatpush3.xpose.msk.msra.mxu1 %vm855_vm3, %v1277_v18  ;;  %2202 = vmatprep.mubr.msk.f32.mxu1 %vm2354_vm2, %v2353_v38 }
 0x4cf   : > { %2210 = vmatprep.subr.mxu1 %v2353_v38  ;;  %2207 = vmatprep.mubr.msk.f32.mxu0 %vm2354_vm2, %v2353_v38 }
 0x4d1   : > { %2203 = vmatmul.mubr.msk.f32.vlgmr.msra.gmra.mrb[8].mxu1 %vm855_vm3, %v1275_v26 }
 0x4d2   : > { %2212 = vmatprep.mubr.msk.f32.mxu1 %vm2354_vm2, %v2353_v38 }
 0x59c   : > { %v2619_v27 = vpop.f32.mrb[0].mxu0 }
 0x59d   : > { %v2189_v28 = vpop.f32.mrb[1].mxu0 }
 0x59e   : > { %v1679_v28 = vld [vmem:[%s2487_s4] sm:$0xff] }
 0x5a0   : > { %v2621_v29 = vpop.f32.mrb[6].mxu1  ;;  %v1270_v30 = vpop.f32.mrb[2].mxu0 }
 0x5a1   : > { %v1352_v31 = vmul.f32 0.25, %v1270_v30  ;;  %v2194_v32 = vpop.f32.mrb[7].mxu1  ;;  %v2199_v33 = vpop.f32.mrb[3].mxu0 }
 0x5a2   : > { %v1682_v32 = vld [vmem:[%s2487_s4 + $0x18] sm:$0xff] }
 0x5a3   : > { %v1354_v34 = vadd.f32 %v1352_v31, %v2585_v56  ;;  %v1681_v31 = vld [vmem:[%s2487_s4 + $0x10] sm:$0xff] }
 0x5a4   : > { %v1348_v36 = vpop.f32.mrb[8].mxu1  ;;  %v2276_v33 = vpack.c.bf16 %v1682_v32, %v1681_v31 }
 0x5a5   : > { %v1353_v39 = vmul.f32 0.25, %v1348_v36  ;;  %v2204_v40 = vpop.f32.mrb[9].mxu1  ;;  %v1356_v41 = vsel %vm1021_vm4, %v1354_v34, -inf }
 0x5a6   : > { %1357 = vmax.xlane.f32.xlu1 %v1356_v41 }
 0x5a7   : > { %v1355_v44 = vadd.f32 %v1353_v39, %v2588_v62  ;;  %v1540_v62 = vld [vmem:[%s2751_s20] sm:$0xff] }
 0x5a8   : > { %v2264_v0 = vpack.c.bf16 %v1541_v63, %v1540_v62  ;;  %v1795_v62 = vld [vmem:[%s2497_s21 + $0x30] sm:$0xff]  ;;  %v1796_v63 = vld [vmem:[%s2497_s21 + $0x38] sm:$0xff] }
 0x5a9   : > { %v1359_v38 = vsel %vm1021_vm4, %v1355_v44, -inf }
 0x5aa   : > { %1360 = vmax.xlane.f32.xlu0 %v1359_v38 }
 0x5c0   : > { %1454 = vrot.lane.b32.xlu0 %v2567_v43, %s2360_s27 }
 0x633   : > { %v1358_v45 = vpop.xlane.xlu1 %1357 }
 0x634   : > { %v1362_v46 = vsub.f32 %v1354_v34, %v1358_v45  ;;  %v2104_v45 = vld [vmem:[%s2753_s0] ss:$0 sm:$0xff] }
 0x636   : > { %v1364_v47 = vmul.f32 1.442695, %v1362_v46 }
 0x637   : > { %v1361_v48 = vpop.xlane.xlu0 %1360 }
 0x638   : > { %2325 = vpow2.f32 %v1364_v47  ;;  %v1363_v49 = vsub.f32 %v1355_v44, %v1361_v48  ;;  %v2105_v47 = vld [vmem:[%s2754_s18] ss:$0 sm:$0xff] }
 0x63a   : > { %v1366_v50 = vmul.f32 1.442695, %v1363_v49 }
 0x63b   : > { %v1455_v51 = vpop.permute.xlu0 %1454 }
 0x63c   : > { %2327 = vpow2.f32 %v1366_v50  ;;  %2211 = vmatpush3.msra.mxu1 %v1455_v51 }
 0x642   : > { %v2326_v52 = vpop.eup %2325 }
 0x643   : > { %v1368_v53 = vsel %vm1021_vm4, %v2326_v52, 0.0 }
 0x644   : > { %1369 = vadd.xlane.f32.xlu1 %v1368_v53 }
 0x646   : > { %v2328_v54 = vpop.eup %2327 }
 0x647   : > { %v1371_v55 = vsel %vm1021_vm4, %v2328_v54, 0.0 }
 0x648   : > { %1372 = vadd.xlane.f32.xlu1 %v1371_v55  ;;  %v1790_v55 = vld [vmem:[%s2497_s21 + $0x8] sm:$0xff] }
 0x659   : > { %1378 = vrot.lane.b32.xlu1 %v2564_v42, %s2360_s27  ;;  %v1542_v42 = vld [vmem:[%s2751_s20 + $0x10] sm:$0xff]  ;;  %s2755_s20 = scalar_lea.vmem %s2724_s11, %s2455_s23 }
 0x65a   : > { %v2268_v2 = vpack.c.bf16 %v1543_v1, %v1542_v42  ;;  %v2106_v42 = vld [vmem:[%s2755_s20] ss:$0 sm:$0xff] }
 0x6d1   : > { %v1370_v43 = vpop.xlane.xlu1 %1369 }
 0x6d2   : > { %2329 = vrcp.f32 %v1370_v43 }
 0x6d5   : > { %v1373_v56 = vpop.xlane.xlu1 %1372 }
 0x6d6   : > { %2331 = vrcp.f32 %v1373_v56  ;;  %v1791_v56 = vld [vmem:[%s2497_s21 + $0x10] sm:$0xff] }
 0x6d9   : > { %v1379_v57 = vpop.permute.xlu1 %1378 }
 0x6da   : > { %2206 = vmatpush3.msra.mxu0 %v1379_v57  ;;  %v1792_v57 = vld [vmem:[%s2497_s21 + $0x18] sm:$0xff] }
 0x6db   : > { %2265 = vmatprep.subr.bf16.mxu0 %v2264_v0 }
 0x6dc   : > { %v2330_v58 = vpop.eup %2329 }
 0x6dd   : > { %v1376_v59 = vmul.f32 %v2330_v58, %v2326_v52  ;;  %v2284_v58 = vpack.c.bf16 %v1792_v57, %v1791_v56 }
 0x6df   : > { %2208 = vmatmul.mubr.msk.f32.vlgmr.msra.gmra.mrb[4].mxu0 %vm1021_vm4, %v1376_v59  ;;  %v1793_v59 = vld [vmem:[%s2497_s21 + $0x20] sm:$0xff] }
 0x6e0   : > { %v2332_v60 = vpop.eup %2331  ;;  %2267 = vmatpush3.bf16.msra.mxu0 %v2264_v0  ;;  %v2292_v0 = vpack.c.bf16 %v1796_v63, %v1795_v62 }
 0x6e1   : > { %v1377_v61 = vmul.f32 %v2332_v60, %v2328_v54  ;;  %2269 = vmatprep.subr.bf16.mxu0 %v2268_v2  ;;  %v1789_v54 = vld [vmem:[%s2497_s21] sm:$0xff]  ;;  %v1794_v60 = vld [vmem:[%s2497_s21 + $0x28] sm:$0xff] }
 0x6e2   : > { %v2280_v43 = vpack.c.bf16 %v1790_v55, %v1789_v54  ;;  %v2113_v54 = vld [vmem:[%s678_s3] ss:$0 sm:$0xff] }
 0x6e3   : > { %2213 = vmatmul.mubr.msk.f32.vlgmr.msra.gmra.mrb[10].mxu1 %vm1021_vm4, %v1377_v61  ;;  %v2288_v61 = vpack.c.bf16 %v1794_v60, %v1793_v59 }
 0x6e4   : > { %2271 = vmatpush3.bf16.msra.mxu0 %v2268_v2 }
 0x6e5   : > { %2281 = vmatprep.subr.bf16.mxu0 %v2280_v43 }
 0x7b2   : > { %v1450_v3 = vpop.f32.mrb[4].mxu0 }
 0x7b3   : > { %1532 = vrot.lane.b32.xlu1 %v1450_v3, %s2361_s30  ;;  %v2209_v4 = vpop.f32.mrb[5].mxu0 }
 0x7b6   : > { %v1526_v5 = vpop.f32.mrb[10].mxu1 }
 0x7b7   : > { %1534 = vrot.lane.b32.xlu1 %v1526_v5, %s2361_s30  ;;  %v2214_v6 = vpop.f32.mrb[11].mxu1 }
 0x825   : > { %v1533_v7 = vpop.permute.xlu1 %1532 }
 0x826   : > { %v1538_v8 = vsel %vm855_vm3, %v2619_v27, %v1533_v7 }
 0x827   : > { %2223 = vmatprep.mubr.msk.f32.mxu0 %vm746_vm1, %v1538_v8 }
 0x829   : > { %v1535_v9 = vpop.permute.xlu1 %1534 }
 0x82a   : > { %v1539_v10 = vsel %vm855_vm3, %v2621_v29, %v1535_v9  ;;  %v1680_v29 = vld [vmem:[%s2487_s4 + $0x8] sm:$0xff] }
 0x82b   : > { %2224 = vmatmul.mubr.msk.f32.vlgmr.msra.gmra.mrb[6].mxu0 %vm746_vm1, %v1539_v10  ;;  %v2272_v30 = vpack.c.bf16 %v1680_v29, %v1679_v28 }
 0x82c   : > { %2283 = vmatpush3.bf16.msra.mxu0 %v2280_v43 }
 0x82d   : > { %2273 = vmatprep.subr.bf16.mxu1 %v2272_v30  ;;  %2285 = vmatprep.subr.bf16.mxu0 %v2284_v58 }
 0x82e   : > { %2275 = vmatpush3.bf16.msra.mxu1 %v2272_v30 }
 0x82f   : > { %2277 = vmatprep.subr.bf16.mxu1 %v2276_v33 }
 0x830   : > { %2287 = vmatpush3.bf16.msra.mxu0 %v2284_v58 }
 0x831   : > { %2289 = vmatprep.subr.bf16.mxu0 %v2288_v61 }
 0x832   : > { %2279 = vmatpush3.bf16.msra.mxu1 %v2276_v33 }
 0x834   : > { %2291 = vmatpush3.bf16.msra.mxu0 %v2288_v61 }
 0x835   : > { %2293 = vmatprep.subr.bf16.mxu0 %v2292_v0 }
 0x838   : > { %2295 = vmatpush3.bf16.msra.mxu0 %v2292_v0 }
 0x8fe   : > { %v2225_v12 = vpop.f32.mrb[6].mxu0 }
 0x8ff   : > { %v1629_v13 = vadd.f32 %v2225_v12, %v2101_v11  ;;  %v1623_v14 = vpop.f32.mrb[7].mxu0 }
 0x900   : > { %v1624_v15 = vadd.f32 %v2101_v11, %v1623_v14 }
 0x901   : > { %v1633_v16 = vadd.f32 %v1629_v13, %v2549_v37 }
 0x902   : > { %v1632_v17 = vadd.f32 %v1624_v15, %v2542_v35 }
 0x903   : > { %v1639_v18 = vsel %vm746_vm1, %v1633_v16, 0.0 }
 0x904   : > { %1640 = vadd.xlane.f32.xlu1 %v1639_v18  ;;  %v1636_v19 = vsel %vm746_vm1, %v1632_v17, 0.0 }
 0x905   : > { %1637 = vadd.xlane.f32.xlu0 %v1636_v19 }
 0x991   : > { %v1641_v20 = vpop.xlane.xlu1 %1640 }
 0x992   : > { %v1644_v21 = vmul.f32 0.03125, %v1641_v20  ;;  %v1638_v22 = vpop.xlane.xlu0 %1637 }
 0x993   : > { %v1643_v23 = vmul.f32 0.03125, %v1638_v22 }
 0x994   : > { %v1646_v24 = vsub.f32 %v1633_v16, %v1644_v21 }
 0x995   : > { %v1645_v25 = vsub.f32 %v1632_v17, %v1643_v23  ;;  %v2109_v23 = vld [vmem:[%s672_s25] ss:$0 sm:$0xff] }
 0x996   : > { %v1648_v35 = vmul.f32 %v1646_v24, %v1646_v24 }
 0x997   : > { %v1647_v26 = vmul.f32 %v1645_v25, %v1645_v25 }
 0x998   : > { %v1652_v27 = vsel %vm746_vm1, %v1648_v35, 0.0 }
 0x999   : > { %v1649_v37 = vsel %vm746_vm1, %v1647_v26, 0.0 }
 0x99a   : > { %1650 = vadd.xlane.f32.xlu0 %v1649_v37 }
 0x99e   : > { %1653 = vadd.xlane.f32.xlu0 %v1652_v27 }
 0xa27   : > { %v1651_v34 = vpop.xlane.xlu0 %1650 }
 0xa28   : > { %v1655_v36 = vmul.f32 0.03125, %v1651_v34 }
 0xa2a   : > { %v1657_v39 = vadd.f32 1e-12, %v1655_v36 }
 0xa2b   : > { %v1654_v40 = vpop.xlane.xlu0 %1653 }
 0xa2c   : > { %2333 = vrsqrt.f32 %v1657_v39  ;;  %v1656_v41 = vmul.f32 0.03125, %v1654_v40 }
 0xa2e   : > { %v1658_v44 = vadd.f32 1e-12, %v1656_v41 }
 0xa30   : > { %2335 = vrsqrt.f32 %v1658_v44 }
 0xa36   : > { %v2334_v38 = vpop.eup %2333 }
 0xa37   : > { %v1661_v46 = vmul.f32 %v2334_v38, %v1645_v25 }
 0xa39   : > { %v1669_v48 = vmul.f32 %v2104_v45, %v1661_v46 }
 0xa3a   : > { %v2336_v49 = vpop.eup %2335 }
 0xa3b   : > { %v1662_v50 = vmul.f32 %v2336_v49, %v1646_v24  ;;  %v1677_v51 = vadd.f32 %v2105_v47, %v1669_v48 }
 0xa3d   : > { %v1670_v52 = vmul.f32 %v2104_v45, %v1662_v50  ;;  %2234 = vmatprep.mubr.msk.f32.mxu1 %vm746_vm1, %v1677_v51 }
 0xa3f   : > { %v1678_v53 = vadd.f32 %v2105_v47, %v1670_v52 }
 0xa41   : > { %2235 = vmatmul.mubr.msk.f32.vlgmr.msra.gmra.mrb[12].mxu1 %vm746_vm1, %v1678_v53 }
 0xb14   : > { %v2236_v1 = vpop.f32.mrb[12].mxu1 }
 0xb15   : > { %v1768_v2 = vadd.f32 %v2236_v1, %v2106_v42  ;;  %v1762_v3 = vpop.f32.mrb[13].mxu1 }
 0xb16   : > { %v1763_v4 = vadd.f32 %v2106_v42, %v1762_v3 }
 0xb17   : > { %v1774_v5 = vmul.f32 0.044715, %v1768_v2  ;;  %v1772_v20 = vmul.f32 0.5, %v1768_v2 }
 0xb18   : > { %v1773_v6 = vmul.f32 0.044715, %v1763_v4  ;;  %v1771_v18 = vmul.f32 0.5, %v1763_v4 }
 0xb19   : > { %v1776_v7 = vmul.f32 %v1774_v5, %v1768_v2 }
 0xb1a   : > { %v1775_v8 = vmul.f32 %v1773_v6, %v1763_v4 }
 0xb1b   : > { %v1778_v9 = vmul.f32 %v1776_v7, %v1768_v2 }
 0xb1c   : > { %v1777_v10 = vmul.f32 %v1775_v8, %v1763_v4 }
 0xb1d   : > { %v1780_v11 = vadd.f32 %v1778_v9, %v1768_v2 }
 0xb1e   : > { %v1779_v12 = vadd.f32 %v1777_v10, %v1763_v4 }
 0xb1f   : > { %v1782_v13 = vmul.f32 0.7978846, %v1780_v11 }
 0xb20   : > { %v1781_v14 = vmul.f32 0.7978846, %v1779_v12 }
 0xb21   : > { %2337 = vtanh.f32 %v1782_v13 }
 0xb22   : > { %2339 = vtanh.f32 %v1781_v14 }
 0xb2b   : > { %v2338_v15 = vpop.eup %2337 }
 0xb2c   : > { %v2340_v16 = vpop.eup %2339  ;;  %v1786_v17 = vadd.f32 1.0, %v2338_v15 }
 0xb2d   : > { %v1785_v19 = vadd.f32 1.0, %v2340_v16 }
 0xb2e   : > { %v1788_v22 = vmul.f32 %v1786_v17, %v1772_v20 }
 0xb2f   : > { %v1787_v21 = vmul.f32 %v1785_v19, %v1771_v18 }
 0xb31   : > { %2253 = vmatprep.mubr.msk.f32.mxu0 %vm1804_vm5, %v1787_v21 }
 0xb32   : > { %2254 = vmatmul.mubr.msk.f32.vlgmr.msra.gmra.mrb[8].mxu0 %vm1804_vm5, %v1788_v22 }
 0xc05   : > { %v2255_v24 = vpop.f32.mrb[8].mxu0 }
 0xc06   : > { %v1883_v25 = vadd.f32 %v2255_v24, %v2109_v23  ;;  %v1877_v26 = vpop.f32.mrb[9].mxu0 }
 0xc07   : > { %v1878_v37 = vadd.f32 %v2109_v23, %v1877_v26 }
 0xc08   : > { %v1887_v35 = vadd.f32 %v1883_v25, %v1678_v53 }
 0xc09   : > { %v1886_v27 = vadd.f32 %v1878_v37, %v1677_v51  ;;  %v2112_v51 = vld [vmem:[%s675_s28] ss:$0 sm:$0xff] }
 0xc0a   : > { %v1893_v28 = vsel %vm746_vm1, %v1887_v35, 0.0 }
 0xc0b   : > { %1894 = vadd.xlane.f32.xlu0 %v1893_v28  ;;  %v1890_v29 = vsel %vm746_vm1, %v1886_v27, 0.0 }
 0xc0c   : > { %1891 = vadd.xlane.f32.xlu1 %v1890_v29 }
 0xc98   : > { %v1895_v30 = vpop.xlane.xlu0 %1894 }
 0xc99   : > { %v1897_v31 = vmul.f32 0.03125, %v1895_v30  ;;  %v1892_v32 = vpop.xlane.xlu1 %1891 }
 0xc9a   : > { %v1896_v33 = vmul.f32 0.03125, %v1892_v32 }
 0xc9b   : > { %v1899_v34 = vsub.f32 %v1887_v35, %v1897_v31 }
 0xc9c   : > { %v1898_v36 = vsub.f32 %v1886_v27, %v1896_v33 }
 0xc9d   : > { %v1901_v39 = vmul.f32 %v1899_v34, %v1899_v34 }
 0xc9e   : > { %v1900_v40 = vmul.f32 %v1898_v36, %v1898_v36 }
 0xc9f   : > { %v1905_v41 = vsel %vm746_vm1, %v1901_v39, 0.0 }
 0xca0   : > { %1906 = vadd.xlane.f32.xlu0 %v1905_v41  ;;  %v1902_v44 = vsel %vm746_vm1, %v1900_v40, 0.0 }
 0xca1   : > { %1903 = vadd.xlane.f32.xlu1 %v1902_v44 }
 0xd2d   : > { %v1907_v38 = vpop.xlane.xlu0 %1906 }
 0xd2e   : > { %v1909_v45 = vmul.f32 0.03125, %v1907_v38  ;;  %v1904_v46 = vpop.xlane.xlu1 %1903 }
 0xd2f   : > { %v1908_v47 = vmul.f32 0.03125, %v1904_v46 }
 0xd30   : > { %v1911_v48 = vadd.f32 1e-12, %v1909_v45 }
 0xd31   : > { %v1910_v49 = vadd.f32 1e-12, %v1908_v47 }
 0xd32   : > { %2341 = vrsqrt.f32 %v1911_v48 }
 0xd33   : > { %2343 = vrsqrt.f32 %v1910_v49 }
 0xd3c   : > { %v2342_v50 = vpop.eup %2341 }
 0xd3d   : > { %v2344_v52 = vpop.eup %2343  ;;  %v1915_v53 = vmul.f32 %v2342_v50, %v1899_v34 }
 0xd3e   : > { %v1914_v55 = vmul.f32 %v2344_v52, %v1898_v36 }
 0xd3f   : > { %v1923_v43 = vmul.f32 %v2112_v51, %v1915_v53 }
 0xd40   : > { %v1922_v56 = vmul.f32 %v2112_v51, %v1914_v55 }
 0xd41   : > { %v1931_v57 = vadd.f32 %v2113_v54, %v1923_v43 }
 0xd42   : > { %v1930_v58 = vadd.f32 %v2113_v54, %v1922_v56 }
 0xd43   : > { %1933 = vst.msk [vmem:[%s2748_s22 + $0x8] sm:$0xff] %vm746_vm1, %v1931_v57 }
 0xd44   : > { %1932 = vst.msk [vmem:[%s2748_s22] sm:$0xff] %vm746_vm1, %v1930_v58 }
 0xd45 PF: > { %s2756_s4 = sld [smem:[#allocation2_spill]] }
 0xd4b   : > { %s26_s21 = sadd.s32 1, %s2756_s4  }
 0xd4c   : > { %p23_p5 = scmp.ge.s32.totalorder %s26_s21, 4  }
 0xd4e   :  { %25 = sbr.rel (!%p23_p5) target bundleno = 7 (0x7), region = 147 }

</bundles_post_ra>
